<compile_context>
chip_gen: v6e
topology: v6e:2x2x1
jax: 0.10.0
libtpu: 0.0.40
codegen_flags: <defaults>
</compile_context>

<pallas_src>
import jax
import jax.numpy as jnp
from jax.experimental import pallas as pl
from jax.experimental.pallas import tpu as pltpu


# ----------------------------------------------------------------------------- kernel
def contrastive_kernel(x_ref, wb_ref, bb_ref, w1_ref, b1_ref, w2_ref, b2_ref, out_ref):
    # x_ref: (BT, C, HW) float32, HW on lanes -> spatial pool is a lane (XLU) reduce.
    # 1/(H*W) is folded into wb in the wrapper, so a plain sum suffices here.
    pooled = jnp.sum(x_ref[...], axis=-1)                                   # (BT, C) f32

    # ---- synthetic backbone linear ----  (bf16 operands, f32 accumulation on the MXU)
    feat = jnp.dot(pooled.astype(jnp.bfloat16), wb_ref[...],
                   preferred_element_type=jnp.float32) + bb_ref[...]        # (BT, D)

    # ---- contrastive head (head == 'mlp'): Linear -> ReLU -> Linear ----
    h = jnp.dot(feat.astype(jnp.bfloat16), w1_ref[...],
                preferred_element_type=jnp.float32) + b1_ref[...]           # (BT, D)
    h = jnp.maximum(h, 0.0)
    f = jnp.dot(h.astype(jnp.bfloat16), w2_ref[...],
                preferred_element_type=jnp.float32) + b2_ref[...]           # (BT, FD)

    # ---- F.normalize(features, dim=1) ----
    # Padded feature columns are exactly zero (zero weights/bias) so they do not change
    # the norm. Clamp sumsq at eps^2 (eps = 1e-12) and use rsqrt (EUP) + multiply.
    sumsq = jnp.sum(f * f, axis=1, keepdims=True)
    inv = jax.lax.rsqrt(jnp.maximum(sumsq, 1e-24))
    out_ref[...] = f * inv


# ----------------------------------------------------------------------------- helpers
def _round_up(n, m):
    return ((n + m - 1) // m) * m


def _choose_bt(B, cap):
    """Pick a batch tile: <= cap, divides B if possible, multiple of 8 (or == B)."""
    cap = max(1, min(B, cap))
    if cap >= B:
        # Whole batch fits in one tile. If B is comfortably large, split into two
        # tiles so the "parallel" batch axis can feed both TensorCores on v7x.
        if B >= 64 and B % 16 == 0:
            return B // 2
        return B
    bt = (cap // 8) * 8
    while bt >= 8:
        if B % bt == 0:
            return bt            # divides B: no ragged tail, no padding
        bt -= 8
    # Fallback: ragged last block (Pallas masks the edge block; no padded copy of x).
    return max(8, (cap // 8) * 8)


def _weight_spec(shape, single_buffer):
    idx = lambda b, _n=len(shape): (0,) * _n
    if single_buffer:
        # Constant-index blocks are DMA'd once; don't pay for a second buffer.
        return pl.BlockSpec(shape, idx, pipeline_mode=pl.Buffered(1))
    return pl.BlockSpec(shape, idx)


# ----------------------------------------------------------------------------- wrapper
def contrastive_forward(x_nchw, params):
    """x_nchw: (B, C, H, W) float32. Returns L2-normalized features (B, features_dim)."""
    B, C, H, W = x_nchw.shape
    HW = H * W
    wb, bb, w1, b1, w2, b2 = params
    backbone_dim = wb.shape[1]
    features_dim = w2.shape[1]

    # Pad hidden / feature dims to lane-aligned (128) widths. Zero padding keeps the
    # math exact and makes every matmul + the final store lane-dense.
    D = _round_up(backbone_dim, 128)
    FD = _round_up(features_dim, 128)

    # Weights -> bf16 (resident VMEM + MXU rate), biases stay f32. Pool scale folded in.
    wb_p = jnp.pad(wb * (1.0 / HW), ((0, 0), (0, D - backbone_dim))).astype(jnp.bfloat16)
    bb_p = jnp.pad(bb.astype(jnp.float32), ((0, 0), (0, D - backbone_dim)))
    w1_p = jnp.pad(w1, ((0, D - backbone_dim), (0, D - backbone_dim))).astype(jnp.bfloat16)
    b1_p = jnp.pad(b1.astype(jnp.float32), ((0, 0), (0, D - backbone_dim)))
    w2_p = jnp.pad(w2, ((0, D - backbone_dim), (0, FD - features_dim))).astype(jnp.bfloat16)
    b2_p = jnp.pad(b2.astype(jnp.float32), ((0, 0), (0, FD - features_dim)))

    # x stays f32; (B, C, H, W) -> (B, C, HW) merges contiguous trailing dims (free,
    # no relayout pass over HBM). HW lands on lanes inside the kernel.
    x3 = x_nchw.reshape(B, C, HW)

    # ---- VMEM budgeting (against the *padded* layout) ----
    try:
        vmem_cap = int(pltpu.get_tpu_info().vmem_capacity_bytes)
    except Exception:
        vmem_cap = 64 << 20                       # conservative (v7x per-TC VMEM)
    scoped = min(vmem_cap * 3 // 4, 96 << 20)     # 48 MiB on v7x, 96 MiB on v5e/v6e

    # Resident weight/bias bytes (worst case: default double buffers if Buffered(1)
    # is unavailable on this jax version).
    w_bytes = 2 * 2 * (wb_p.size + w1_p.size + w2_p.size) \
              + 2 * 4 * (bb_p.size + b1_p.size + b2_p.size)

    # Per-batch-row VMEM cost of the pipelined x / out blocks, in padded layout
    # (sublanes round to 8, lanes to 128), double-buffered.
    x_row_bytes = _round_up(C, 8) * _round_up(HW, 128) * 4
    out_row_bytes = FD * 4
    budget = max(2 * (x_row_bytes + out_row_bytes), scoped - w_bytes - (4 << 20))
    max_bt = max(1, budget // (2 * (x_row_bytes + out_row_bytes)))

    BT = _choose_bt(B, min(max_bt, 512))
    nb = pl.cdiv(B, BT)

    def run(single_buffer_weights):
        in_specs = [pl.BlockSpec((BT, C, HW), lambda b: (b, 0, 0))] + [
            _weight_spec(a.shape, single_buffer_weights)
            for a in (wb_p, bb_p, w1_p, b1_p, w2_p, b2_p)
        ]
        return pl.pallas_call(
            contrastive_kernel,
            out_shape=jax.ShapeDtypeStruct((B, FD), jnp.float32),
            grid_spec=pltpu.PrefetchScalarGridSpec(
                num_scalar_prefetch=0,
                grid=(nb,),
                in_specs=in_specs,
                out_specs=pl.BlockSpec((BT, FD), lambda b: (b, 0)),
            ),
            compiler_params=pltpu.CompilerParams(
                dimension_semantics=("parallel",),   # shard batch tiles across TCs (v7x)
                vmem_limit_bytes=int(scoped),
            ),
        )(x3, wb_p, bb_p, w1_p, b1_p, w2_p, b2_p)

    try:
        out = run(single_buffer_weights=True)
    except Exception:
        # pipeline_mode=pl.Buffered(1) not supported on this jax version -> default buffering.
        out = run(single_buffer_weights=False)

    return out[:, :features_dim]


# ----------------------------------------------------------------------------- params / references
def init_params(key, in_channels, backbone_dim, features_dim):
    """Deterministic synthetic parameters (weights as (in, out); biases as (1, out))."""
    k = jax.random.split(key, 6)
    wb = jax.random.normal(k[0], (in_channels, backbone_dim), jnp.float32) * 0.1
    bb = jax.random.normal(k[1], (1, backbone_dim), jnp.float32) * 0.01
    w1 = jax.random.normal(k[2], (backbone_dim, backbone_dim), jnp.float32) * 0.1
    b1 = jax.random.normal(k[3], (1, backbone_dim), jnp.float32) * 0.01
    w2 = jax.random.normal(k[4], (backbone_dim, features_dim), jnp.float32) * 0.1
    b2 = jax.random.normal(k[5], (1, features_dim), jnp.float32) * 0.01
    return (wb, bb, w1, b1, w2, b2)


def reference_forward(x_nchw, params):
    """Pure-f32 reference of the module forward (mean pool -> linear -> mlp -> normalize)."""
    wb, bb, w1, b1, w2, b2 = params
    B, C, H, W = x_nchw.shape
    pooled = jnp.mean(x_nchw.reshape(B, C, H * W), axis=-1)
    feat = pooled @ wb + bb
    h = jnp.maximum(feat @ w1 + b1, 0.0)
    f = h @ w2 + b2
    norm = jnp.maximum(jnp.sqrt(jnp.sum(f * f, axis=1, keepdims=True)), 1e-12)
    return f / norm


def reference_forward_mixed(x_nchw, params):
    """Pure-JAX reference with the kernel's exact mixed precision (bf16 weights/operands)."""
    wb, bb, w1, b1, w2, b2 = params
    B, C, H, W = x_nchw.shape
    HW = H * W
    wbq = (wb * (1.0 / HW)).astype(jnp.bfloat16)
    w1q = w1.astype(jnp.bfloat16)
    w2q = w2.astype(jnp.bfloat16)
    pooled = jnp.sum(x_nchw.reshape(B, C, HW), axis=-1)
    feat = jnp.dot(pooled.astype(jnp.bfloat16), wbq, preferred_element_type=jnp.float32) + bb
    h = jnp.maximum(jnp.dot(feat.astype(jnp.bfloat16), w1q,
                            preferred_element_type=jnp.float32) + b1, 0.0)
    f = jnp.dot(h.astype(jnp.bfloat16), w2q, preferred_element_type=jnp.float32) + b2
    norm = jnp.sqrt(jnp.maximum(jnp.sum(f * f, axis=1, keepdims=True), 1e-24))
    return f / norm


# ----------------------------------------------------------------------------- main
if __name__ == "__main__":
    # Small shapes consistent with the module's forward: NCHW image input.
    B, C, H, W = 2, 4, 16, 16
    backbone_dim, features_dim = 32, 16

    key = jax.random.PRNGKey(0)
    kx, kp = jax.random.split(key)
    x = jax.random.normal(kx, (B, C, H, W), jnp.float32)
    params = init_params(kp, C, backbone_dim, features_dim)

    out = jax.block_until_ready(contrastive_forward(x, params))
    ref_mixed = reference_forward_mixed(x, params)
    ref_exact = reference_forward(x, params)

    assert out.shape == (B, features_dim)
    # Tight check vs an identically-quantized reference, loose check vs the f32 module math.
    assert jnp.allclose(out, ref_mixed, atol=5e-3, rtol=5e-3), "mismatch vs mixed-precision ref"
    assert jnp.allclose(out, ref_exact, atol=3e-2, rtol=3e-2), "mismatch vs f32 module ref"
    # rows should be unit-norm
    assert jnp.allclose(jnp.linalg.norm(out, axis=1), 1.0, atol=1e-3)

    print("KERNEL_OK")
</pallas_src>

<mosaic_0001>
module attributes {stable_mosaic.version = 11 : i64} {
  func.func @contrastive_kernel(%arg0: i32, %arg1: memref<2x4x256xf32, #tpu.memory_space<vmem>>, %arg2: memref<4x128xbf16, #tpu.memory_space<vmem>>, %arg3: memref<1x128xf32, #tpu.memory_space<vmem>>, %arg4: memref<128x128xbf16, #tpu.memory_space<vmem>>, %arg5: memref<1x128xf32, #tpu.memory_space<vmem>>, %arg6: memref<128x128xbf16, #tpu.memory_space<vmem>>, %arg7: memref<1x128xf32, #tpu.memory_space<vmem>>, %arg8: memref<2x128xf32, #tpu.memory_space<vmem>>) attributes {dimension_semantics = [#tpu.dimension_semantics<parallel>], iteration_bounds = array<i64: 1>, scalar_prefetch = 0 : i64, scratch_operands = 0 : i64, tpu.core_type = #tpu.core_type<tc>, window_params = [{transform_indices = @transform_0, window_bounds = array<i64: 2, 4, 256>}, {pipeline_mode = #tpu.pipeline_mode<synchronous>, transform_indices = @transform_1, window_bounds = array<i64: 4, 128>}, {pipeline_mode = #tpu.pipeline_mode<synchronous>, transform_indices = @transform_2, window_bounds = array<i64: 1, 128>}, {pipeline_mode = #tpu.pipeline_mode<synchronous>, transform_indices = @transform_3, window_bounds = array<i64: 128, 128>}, {pipeline_mode = #tpu.pipeline_mode<synchronous>, transform_indices = @transform_4, window_bounds = array<i64: 1, 128>}, {pipeline_mode = #tpu.pipeline_mode<synchronous>, transform_indices = @transform_5, window_bounds = array<i64: 128, 128>}, {pipeline_mode = #tpu.pipeline_mode<synchronous>, transform_indices = @transform_6, window_bounds = array<i64: 1, 128>}, {transform_indices = @transform_7, window_bounds = array<i64: 2, 128>}]} {
    %c0 = arith.constant 0 : index
    %c0_0 = arith.constant 0 : index
    %c0_1 = arith.constant 0 : index
    %0 = vector.load %arg1[%c0, %c0_0, %c0_1] : memref<2x4x256xf32, #tpu.memory_space<vmem>>, vector<2x4x256xf32>
    %cst = arith.constant dense<0.000000e+00> : vector<2x4xf32>
    %1 = vector.multi_reduction <add>, %0, %cst [2] : vector<2x4x256xf32> to vector<2x4xf32>
    %2 = arith.truncf %1 : vector<2x4xf32> to vector<2x4xbf16>
    %c0_2 = arith.constant 0 : index
    %c0_3 = arith.constant 0 : index
    %3 = vector.load %arg2[%c0_2, %c0_3] : memref<4x128xbf16, #tpu.memory_space<vmem>>, vector<4x128xbf16>
    %cst_4 = arith.constant dense<0.000000e+00> : vector<2x128xf32>
    %4 = tpu.matmul %2, %3, %cst_4 {dimension_numbers = #tpu.dot_dimension_numbers<[1], [0], [0], [1], [0, 0, 1, 1], [], []>} : vector<2x4xbf16>, vector<4x128xbf16>, vector<2x128xf32> -> vector<2x128xf32>
    %c0_5 = arith.constant 0 : index
    %c0_6 = arith.constant 0 : index
    %5 = vector.load %arg3[%c0_5, %c0_6] : memref<1x128xf32, #tpu.memory_space<vmem>>, vector<1x128xf32>
    %6 = vector.broadcast %5 : vector<1x128xf32> to vector<2x128xf32>
    %7 = arith.addf %4, %6 : vector<2x128xf32>
    %8 = arith.truncf %7 : vector<2x128xf32> to vector<2x128xbf16>
    %c0_7 = arith.constant 0 : index
    %c0_8 = arith.constant 0 : index
    %9 = vector.load %arg4[%c0_7, %c0_8] : memref<128x128xbf16, #tpu.memory_space<vmem>>, vector<128x128xbf16>
    %cst_9 = arith.constant dense<0.000000e+00> : vector<2x128xf32>
    %10 = tpu.matmul %8, %9, %cst_9 {dimension_numbers = #tpu.dot_dimension_numbers<[1], [0], [0], [1], [0, 0, 1, 1], [], []>} : vector<2x128xbf16>, vector<128x128xbf16>, vector<2x128xf32> -> vector<2x128xf32>
    %c0_10 = arith.constant 0 : index
    %c0_11 = arith.constant 0 : index
    %11 = vector.load %arg5[%c0_10, %c0_11] : memref<1x128xf32, #tpu.memory_space<vmem>>, vector<1x128xf32>
    %12 = vector.broadcast %11 : vector<1x128xf32> to vector<2x128xf32>
    %13 = arith.addf %10, %12 : vector<2x128xf32>
    %cst_12 = arith.constant 0.000000e+00 : f32
    %14 = vector.broadcast %cst_12 : f32 to vector<2x128xf32>
    %15 = arith.maximumf %13, %14 : vector<2x128xf32>
    %16 = arith.truncf %15 : vector<2x128xf32> to vector<2x128xbf16>
    %c0_13 = arith.constant 0 : index
    %c0_14 = arith.constant 0 : index
    %17 = vector.load %arg6[%c0_13, %c0_14] : memref<128x128xbf16, #tpu.memory_space<vmem>>, vector<128x128xbf16>
    %cst_15 = arith.constant dense<0.000000e+00> : vector<2x128xf32>
    %18 = tpu.matmul %16, %17, %cst_15 {dimension_numbers = #tpu.dot_dimension_numbers<[1], [0], [0], [1], [0, 0, 1, 1], [], []>} : vector<2x128xbf16>, vector<128x128xbf16>, vector<2x128xf32> -> vector<2x128xf32>
    %c0_16 = arith.constant 0 : index
    %c0_17 = arith.constant 0 : index
    %19 = vector.load %arg7[%c0_16, %c0_17] : memref<1x128xf32, #tpu.memory_space<vmem>>, vector<1x128xf32>
    %20 = vector.broadcast %19 : vector<1x128xf32> to vector<2x128xf32>
    %21 = arith.addf %18, %20 : vector<2x128xf32>
    %22 = arith.mulf %21, %21 : vector<2x128xf32>
    %cst_18 = arith.constant dense<0.000000e+00> : vector<2xf32>
    %23 = vector.multi_reduction <add>, %22, %cst_18 [1] : vector<2x128xf32> to vector<2xf32>
    %24 = vector.shape_cast %23 : vector<2xf32> to vector<2x1xf32>
    %cst_19 = arith.constant 1.000000e-24 : f32
    %25 = vector.broadcast %cst_19 : f32 to vector<2x1xf32>
    %26 = arith.maximumf %24, %25 : vector<2x1xf32>
    %27 = math.rsqrt %26 : vector<2x1xf32>
    %28 = vector.broadcast %27 : vector<2x1xf32> to vector<2x128xf32>
    %29 = arith.mulf %21, %28 : vector<2x128xf32>
    %c0_20 = arith.constant 0 : index
    %c0_21 = arith.constant 0 : index
    %30 = vector.load %arg8[%c0_20, %c0_21] : memref<2x128xf32, #tpu.memory_space<vmem>>, vector<2x128xf32>
    tpu.vector_store %arg8[%c0_20, %c0_21], %29 {strides = array<i32>} : memref<2x128xf32, #tpu.memory_space<vmem>>, vector<2x128xf32>,
    return
  }
  func.func @transform_0(%arg0: i32) -> (i32, i32, i32) {
    %c0_i32 = arith.constant 0 : i32
    %c0_i32_0 = arith.constant 0 : i32
    %c0_i32_1 = arith.constant 0 : i32
    return %arg0, %c0_i32, %c0_i32_0 : i32, i32, i32
  }
  func.func @transform_1(%arg0: i32) -> (i32, i32) {
    %c0_i32 = arith.constant 0 : i32
    %c0_i32_0 = arith.constant 0 : i32
    %c0_i32_1 = arith.constant 0 : i32
    return %c0_i32, %c0_i32_0 : i32, i32
  }
  func.func @transform_2(%arg0: i32) -> (i32, i32) {
    %c0_i32 = arith.constant 0 : i32
    %c0_i32_0 = arith.constant 0 : i32
    %c0_i32_1 = arith.constant 0 : i32
    return %c0_i32, %c0_i32_0 : i32, i32
  }
  func.func @transform_3(%arg0: i32) -> (i32, i32) {
    %c0_i32 = arith.constant 0 : i32
    %c0_i32_0 = arith.constant 0 : i32
    %c0_i32_1 = arith.constant 0 : i32
    return %c0_i32, %c0_i32_0 : i32, i32
  }
  func.func @transform_4(%arg0: i32) -> (i32, i32) {
    %c0_i32 = arith.constant 0 : i32
    %c0_i32_0 = arith.constant 0 : i32
    %c0_i32_1 = arith.constant 0 : i32
    return %c0_i32, %c0_i32_0 : i32, i32
  }
  func.func @transform_5(%arg0: i32) -> (i32, i32) {
    %c0_i32 = arith.constant 0 : i32
    %c0_i32_0 = arith.constant 0 : i32
    %c0_i32_1 = arith.constant 0 : i32
    return %c0_i32, %c0_i32_0 : i32, i32
  }
  func.func @transform_6(%arg0: i32) -> (i32, i32) {
    %c0_i32 = arith.constant 0 : i32
    %c0_i32_0 = arith.constant 0 : i32
    %c0_i32_1 = arith.constant 0 : i32
    return %c0_i32, %c0_i32_0 : i32, i32
  }
  func.func @transform_7(%arg0: i32) -> (i32, i32) {
    %c0_i32 = arith.constant 0 : i32
    %c0_i32_0 = arith.constant 0 : i32
    return %arg0, %c0_i32 : i32, i32
  }
}

module attributes {stable_mosaic.version = 11 : i64} {
  func.func @contrastive_kernel(%arg0: i32, %arg1: memref<2x4x256xf32, #tpu.memory_space<vmem>>, %arg2: memref<4x128xbf16, #tpu.memory_space<vmem>>, %arg3: memref<1x128xf32, #tpu.memory_space<vmem>>, %arg4: memref<128x128xbf16, #tpu.memory_space<vmem>>, %arg5: memref<1x128xf32, #tpu.memory_space<vmem>>, %arg6: memref<128x128xbf16, #tpu.memory_space<vmem>>, %arg7: memref<1x128xf32, #tpu.memory_space<vmem>>, %arg8: memref<2x128xf32, #tpu.memory_space<vmem>>) attributes {dimension_semantics = [#tpu.dimension_semantics<parallel>], iteration_bounds = array<i64: 1>, scalar_prefetch = 0 : i64, scratch_operands = 0 : i64, tpu.core_type = #tpu.core_type<tc>, window_params = [{transform_indices = @transform_0, window_bounds = array<i64: 2, 4, 256>}, {pipeline_mode = #tpu.pipeline_mode<synchronous>, transform_indices = @transform_1, window_bounds = array<i64: 4, 128>}, {pipeline_mode = #tpu.pipeline_mode<synchronous>, transform_indices = @transform_2, window_bounds = array<i64: 1, 128>}, {pipeline_mode = #tpu.pipeline_mode<synchronous>, transform_indices = @transform_3, window_bounds = array<i64: 128, 128>}, {pipeline_mode = #tpu.pipeline_mode<synchronous>, transform_indices = @transform_4, window_bounds = array<i64: 1, 128>}, {pipeline_mode = #tpu.pipeline_mode<synchronous>, transform_indices = @transform_5, window_bounds = array<i64: 128, 128>}, {pipeline_mode = #tpu.pipeline_mode<synchronous>, transform_indices = @transform_6, window_bounds = array<i64: 1, 128>}, {transform_indices = @transform_7, window_bounds = array<i64: 2, 128>}]} {
    %c0 = arith.constant 0 : index
    %c0_0 = arith.constant 0 : index
    %c0_1 = arith.constant 0 : index
    %0 = vector.load %arg1[%c0, %c0_0, %c0_1] : memref<2x4x256xf32, #tpu.memory_space<vmem>>, vector<2x4x256xf32>
    %cst = arith.constant dense<0.000000e+00> : vector<2x4xf32>
    %1 = vector.multi_reduction <add>, %0, %cst [2] : vector<2x4x256xf32> to vector<2x4xf32>
    %2 = arith.truncf %1 : vector<2x4xf32> to vector<2x4xbf16>
    %c0_2 = arith.constant 0 : index
    %c0_3 = arith.constant 0 : index
    %3 = vector.load %arg2[%c0_2, %c0_3] : memref<4x128xbf16, #tpu.memory_space<vmem>>, vector<4x128xbf16>
    %cst_4 = arith.constant dense<0.000000e+00> : vector<2x128xf32>
    %4 = tpu.matmul %2, %3, %cst_4 {dimension_numbers = #tpu.dot_dimension_numbers<[1], [0], [0], [1], [0, 0, 1, 1], [], []>} : vector<2x4xbf16>, vector<4x128xbf16>, vector<2x128xf32> -> vector<2x128xf32>
    %c0_5 = arith.constant 0 : index
    %c0_6 = arith.constant 0 : index
    %5 = vector.load %arg3[%c0_5, %c0_6] : memref<1x128xf32, #tpu.memory_space<vmem>>, vector<1x128xf32>
    %6 = vector.broadcast %5 : vector<1x128xf32> to vector<2x128xf32>
    %7 = arith.addf %4, %6 : vector<2x128xf32>
    %8 = arith.truncf %7 : vector<2x128xf32> to vector<2x128xbf16>
    %c0_7 = arith.constant 0 : index
    %c0_8 = arith.constant 0 : index
    %9 = vector.load %arg4[%c0_7, %c0_8] : memref<128x128xbf16, #tpu.memory_space<vmem>>, vector<128x128xbf16>
    %cst_9 = arith.constant dense<0.000000e+00> : vector<2x128xf32>
    %10 = tpu.matmul %8, %9, %cst_9 {dimension_numbers = #tpu.dot_dimension_numbers<[1], [0], [0], [1], [0, 0, 1, 1], [], []>} : vector<2x128xbf16>, vector<128x128xbf16>, vector<2x128xf32> -> vector<2x128xf32>
    %c0_10 = arith.constant 0 : index
    %c0_11 = arith.constant 0 : index
    %11 = vector.load %arg5[%c0_10, %c0_11] : memref<1x128xf32, #tpu.memory_space<vmem>>, vector<1x128xf32>
    %12 = vector.broadcast %11 : vector<1x128xf32> to vector<2x128xf32>
    %13 = arith.addf %10, %12 : vector<2x128xf32>
    %cst_12 = arith.constant 0.000000e+00 : f32
    %14 = vector.broadcast %cst_12 : f32 to vector<2x128xf32>
    %15 = arith.maximumf %13, %14 : vector<2x128xf32>
    %16 = arith.truncf %15 : vector<2x128xf32> to vector<2x128xbf16>
    %c0_13 = arith.constant 0 : index
    %c0_14 = arith.constant 0 : index
    %17 = vector.load %arg6[%c0_13, %c0_14] : memref<128x128xbf16, #tpu.memory_space<vmem>>, vector<128x128xbf16>
    %cst_15 = arith.constant dense<0.000000e+00> : vector<2x128xf32>
    %18 = tpu.matmul %16, %17, %cst_15 {dimension_numbers = #tpu.dot_dimension_numbers<[1], [0], [0], [1], [0, 0, 1, 1], [], []>} : vector<2x128xbf16>, vector<128x128xbf16>, vector<2x128xf32> -> vector<2x128xf32>
    %c0_16 = arith.constant 0 : index
    %c0_17 = arith.constant 0 : index
    %19 = vector.load %arg7[%c0_16, %c0_17] : memref<1x128xf32, #tpu.memory_space<vmem>>, vector<1x128xf32>
    %20 = vector.broadcast %19 : vector<1x128xf32> to vector<2x128xf32>
    %21 = arith.addf %18, %20 : vector<2x128xf32>
    %22 = arith.mulf %21, %21 : vector<2x128xf32>
    %cst_18 = arith.constant dense<0.000000e+00> : vector<2xf32>
    %23 = vector.multi_reduction <add>, %22, %cst_18 [1] : vector<2x128xf32> to vector<2xf32>
    %24 = vector.shape_cast %23 : vector<2xf32> to vector<2x1xf32>
    %cst_19 = arith.constant 1.000000e-24 : f32
    %25 = vector.broadcast %cst_19 : f32 to vector<2x1xf32>
    %26 = arith.maximumf %24, %25 : vector<2x1xf32>
    %27 = math.rsqrt %26 : vector<2x1xf32>
    %28 = vector.broadcast %27 : vector<2x1xf32> to vector<2x128xf32>
    %29 = arith.mulf %21, %28 : vector<2x128xf32>
    %c0_20 = arith.constant 0 : index
    %c0_21 = arith.constant 0 : index
    %30 = vector.load %arg8[%c0_20, %c0_21] : memref<2x128xf32, #tpu.memory_space<vmem>>, vector<2x128xf32>
    tpu.vector_store %arg8[%c0_20, %c0_21], %29 {strides = array<i32>} : memref<2x128xf32, #tpu.memory_space<vmem>>, vector<2x128xf32>,
    return
  }
  func.func @transform_0(%arg0: i32) -> (i32, i32, i32) {
    %c0_i32 = arith.constant 0 : i32
    %c0_i32_0 = arith.constant 0 : i32
    %c0_i32_1 = arith.constant 0 : i32
    return %arg0, %c0_i32, %c0_i32_0 : i32, i32, i32
  }
  func.func @transform_1(%arg0: i32) -> (i32, i32) {
    %c0_i32 = arith.constant 0 : i32
    %c0_i32_0 = arith.constant 0 : i32
    %c0_i32_1 = arith.constant 0 : i32
    return %c0_i32, %c0_i32_0 : i32, i32
  }
  func.func @transform_2(%arg0: i32) -> (i32, i32) {
    %c0_i32 = arith.constant 0 : i32
    %c0_i32_0 = arith.constant 0 : i32
    %c0_i32_1 = arith.constant 0 : i32
    return %c0_i32, %c0_i32_0 : i32, i32
  }
  func.func @transform_3(%arg0: i32) -> (i32, i32) {
    %c0_i32 = arith.constant 0 : i32
    %c0_i32_0 = arith.constant 0 : i32
    %c0_i32_1 = arith.constant 0 : i32
    return %c0_i32, %c0_i32_0 : i32, i32
  }
  func.func @transform_4(%arg0: i32) -> (i32, i32) {
    %c0_i32 = arith.constant 0 : i32
    %c0_i32_0 = arith.constant 0 : i32
    %c0_i32_1 = arith.constant 0 : i32
    return %c0_i32, %c0_i32_0 : i32, i32
  }
  func.func @transform_5(%arg0: i32) -> (i32, i32) {
    %c0_i32 = arith.constant 0 : i32
    %c0_i32_0 = arith.constant 0 : i32
    %c0_i32_1 = arith.constant 0 : i32
    return %c0_i32, %c0_i32_0 : i32, i32
  }
  func.func @transform_6(%arg0: i32) -> (i32, i32) {
    %c0_i32 = arith.constant 0 : i32
    %c0_i32_0 = arith.constant 0 : i32
    %c0_i32_1 = arith.constant 0 : i32
    return %c0_i32, %c0_i32_0 : i32, i32
  }
  func.func @transform_7(%arg0: i32) -> (i32, i32) {
    %c0_i32 = arith.constant 0 : i32
    %c0_i32_0 = arith.constant 0 : i32
    return %arg0, %c0_i32 : i32, i32
  }
}

</mosaic_0001>

<bundles_post_ra>
// kernel: tpu_custom_call.1
= control target key start
LH: loop header
LB: loop body
LE: loop exit
PB: predicated region body
PF: predicated region fallthrough
CT: control target
= control target key end

     0   :  { %12 = vsyncpa [#allocation3], 0  ;;  %s750_s0 = inlined_call_operand.hbm [shape: f32[2,4,256], index: 0, kind: input, shape index: {}]   ;;  %s751_s1 = inlined_call_operand.hbm [shape: bf16[4,128], index: 1, kind: input, shape index: {}]   ;;  %s752_s2 = inlined_call_operand.vmem [shape: f32[1,128], index: 2, kind: input, shape index: {}]   ;;  %s753_s3 = inlined_call_operand.hbm [shape: bf16[128,128], index: 3, kind: input, shape index: {}]   ;;  %s754_s4 = inlined_call_operand.vmem [shape: f32[1,128], index: 4, kind: input, shape index: {}]   ;;  %s755_s5 = inlined_call_operand.hbm [shape: bf16[128,128], index: 5, kind: input, shape index: {}]   ;;  %s756_s6 = inlined_call_operand.vmem [shape: f32[1,128], index: 6, kind: input, shape index: {}]   ;;  %s757_s7 = inlined_call_operand.hbm [shape: f32[2,128], index: 7, kind: output, shape index: {}]  }
   0x1   :  { %13 = vsyncpa [#allocation6], 0 }
   0x2   :  { %14 = vsyncpa [#allocation9], 0 }
   0x3   :  { %15 = vsyncpa [#allocation4], 0  ;;  %s650_s24 = smov [#allocation5]   ;;  %s651_s26 = smov [#allocation2]  }
   0x4   :  { %s34_s25 = sshll.u32 %s650_s24, 4  ;;  %s21_s27 = sshll.u32 %s651_s26, 4  ;;  %s35_s25 = int_to_ptr.vmem [resolvable:$true] %s34_s25  ;;  %s22_s27 = int_to_ptr.vmem [resolvable:$true] %s21_s27 }
   0x5   :  { %s550_s28 = scalar_lea.vmem %s35_s25, 32  ;;  %p555_p1 = scmp.lt.s32.totalorder %s35_s25, %s35_s25 }
   0x6   :  { %p551_p0 = scmp.ne.s32.totalorder %s35_s25, %s550_s28  ;;  %p556_p2 = scmp.lt.s32.totalorder %s550_s28, %s550_s28 }
   0x8   :  { %p557_p3 = por %p556_p2, %p555_p1 }
   0xa   :  { %p558_p4 = pnand %p557_p3, %p551_p0 }
   0xc   :  { %561 = shalt.err (!%p558_p4)
}
   0xd   :  { %37 = dma.hbm_to_vmem [thread:$0]  %s751_s1, 32, %s35_s25, [#allocation6]  }
   0xe   :  { %s570_s8 = scalar_lea.vmem %s22_s27, 256  ;;  %p575_p6 = scmp.lt.s32.totalorder %s22_s27, %s22_s27 }
   0xf   :  { %p571_p5 = scmp.ne.s32.totalorder %s22_s27, %s570_s8  ;;  %p576_p7 = scmp.lt.s32.totalorder %s570_s8, %s570_s8 }
  0x11   :  { %p577_p8 = por %p576_p7, %p575_p6 }
  0x13   :  { %p578_p9 = pnand %p577_p8, %p571_p5 }
  0x15   :  { %581 = shalt.err (!%p578_p9)
}
  0x16   :  { %s652_s9 = smov 128   ;;  %s653_s10 = smov 8  }
  0x17   :  { %27 = dma.hbm_to_vmem [thread:$0]  %s750_s0, 256, %s22_s27, [#allocation3], %s652_s9, %s652_s9, %s653_s10  }
  0x18   :  { %s654_s13 = smov [#allocation7]  }
  0x19   :  { %s45_s14 = sshll.u32 %s654_s13, 4  ;;  %s46_s14 = int_to_ptr.vmem [resolvable:$true] %s45_s14 }
  0x1a   :  { %s590_s15 = scalar_lea.vmem %s46_s14, 1024  ;;  %p595_p11 = scmp.lt.s32.totalorder %s46_s14, %s46_s14 }
  0x1b   :  { %p591_p10 = scmp.ne.s32.totalorder %s46_s14, %s590_s15  ;;  %p596_p12 = scmp.lt.s32.totalorder %s590_s15, %s590_s15 }
  0x1d   :  { %p597_p13 = por %p596_p12, %p595_p11 }
  0x1f   :  { %p598_p0 = pnand %p597_p13, %p591_p10 }
  0x21   :  { %601 = shalt.err (!%p598_p0)
}
  0x22   :  { %s655_s1 = smov 64   ;;  %s656_s16 = smov 4  }
  0x23   :  { %51 = dma.hbm_to_vmem [thread:$0]  %s753_s3, 1024, %s46_s14, [#allocation6], %s655_s1, %s655_s1, %s656_s16  }
  0x24   :  { %s657_s19 = smov [#allocation8]  }
  0x25   :  { %s59_s20 = sshll.u32 %s657_s19, 4  ;;  %s60_s20 = int_to_ptr.vmem [resolvable:$true] %s59_s20 }
  0x26   :  { %s610_s0 = scalar_lea.vmem %s60_s20, 1024  ;;  %p615_p2 = scmp.lt.s32.totalorder %s60_s20, %s60_s20 }
  0x27   :  { %p611_p1 = scmp.ne.s32.totalorder %s60_s20, %s610_s0  ;;  %p616_p3 = scmp.lt.s32.totalorder %s610_s0, %s610_s0 }
  0x29   :  { %p617_p4 = por %p616_p3, %p615_p2 }
  0x2b   :  { %p618_p5 = pnand %p617_p4, %p611_p1 }
  0x2d   :  { %621 = shalt.err (!%p618_p5)
}
  0x2e   :  { %65 = dma.hbm_to_vmem [thread:$0]  %s755_s5, 1024, %s60_s20, [#allocation9], %s655_s1, %s655_s1, %s656_s16  }
  0x2f   :  { %642 = dma.done.wait [#allocation3], 256  }
  0x30   :  { %643 = vsyncadd [#allocation3], 4294967040 }
  0x31   :  { %644 = dma.done.wait [#allocation6], 1056  }
  0x32   :  { %645 = vsyncadd [#allocation6], 4294966240 }
  0x33   :  { %646 = dma.done.wait [#allocation9], 1024  }
  0x34   :  { %647 = vsyncadd [#allocation9], 4294966272  ;;  %vm89_vm0 = vcmask 1043456   ;;  %v81_v0 = vld [vmem:[#allocation2] sm:$0xff]  ;;  %v82_v1 = vld [vmem:[#allocation2 + $0x8] sm:$0xff]  ;;  %vm131_vm1 = vcmask 1041408   ;;  %v114_v20 = vlaneseq }
  0x35   :  { %v85_v2 = vcombine.high %v81_v0, %v81_v0  ;;  %v90_v3 = vsel %vm89_vm0, %v81_v0, 0.0  ;;  %v86_v4 = vcombine.high %v82_v1, %v82_v1  ;;  %v95_v5 = vsel %vm89_vm0, %v82_v1, 0.0  ;;  %v102_v10 = vld [vmem:[#allocation5] sm:$0x3]  ;;  %v525_v14 = vld [vmem:[#allocation7 + $0x30] sm:$0xff]   ;;  %v526_v15 = vld [vmem:[#allocation7 + $0x28] sm:$0xff]  }
  0x36   :  { %v658_v11 = vmov 0.0   ;;  %v133_v12 = vsel %vm131_vm1, %v102_v10, 0  ;;  %vm659_vm2 = vmmov 0   ;;  %v524_v13 = vld [vmem:[#allocation7 + $0x38] sm:$0xff]   ;;  %v527_v16 = vld [vmem:[#allocation7 + $0x20] sm:$0xff]   ;;  %v529_v18 = vld [vmem:[#allocation7 + $0x10] sm:$0xff]  }
  0x37   :  { %v91_v6 = vsel %vm89_vm0, %v85_v2, 0.0  ;;  %v96_v7 = vsel %vm89_vm0, %v86_v4, 0.0  ;;  %465 = vmatprep.subr.bf16.mxu0 %v658_v11  ;;  %471 = vmatprep.subr.bf16.mxu1 %v658_v11  ;;  %v528_v17 = vld [vmem:[#allocation7 + $0x18] sm:$0xff]   ;;  %v530_v19 = vld [vmem:[#allocation7 + $0x8] sm:$0xff]   ;;  %v115_v22 = vand.u32 127, %v114_v20  ;;  %v117_v23 = vshrl.u32 %v114_v20, 7 }
  0x38   :  { %v92_v8 = vadd.f32 %v91_v6, %v90_v3  ;;  %v97_v9 = vadd.f32 %v96_v7, %v95_v5  ;;  %466 = vmatpush3.bf16.msra.mxu0 %v133_v12  ;;  %467 = vmatprep.mubr.msk.bf16.mxu0 %vm659_vm2, %v658_v11  ;;  %vm124_vm3 = vcmask 1041409   ;;  %vm127_vm4 = vcmask 31744   ;;  %v531_v34 = vld [vmem:[#allocation7] sm:$0xff]   ;;  %v532_v35 = vld [vmem:[#allocation8 + $0x38] sm:$0xff]   ;;  %v533_v36 = vld [vmem:[#allocation8 + $0x30] sm:$0xff]  }
  0x39   :  { %491 = vmatprep.subr.bf16.mxu0 %v658_v11  ;;  %487 = vmatprep.mubr.msk.bf16.mxu1 %vm659_vm2, %v658_v11  ;;  %v118_v26 = vsub.s32 %v115_v22, %v117_v23  ;;  %v534_v37 = vld [vmem:[#allocation8 + $0x28] sm:$0xff]   ;;  %v535_v38 = vld [vmem:[#allocation8 + $0x20] sm:$0xff]   ;;  %v536_v39 = vld [vmem:[#allocation8 + $0x18] sm:$0xff]  }
  0x3a   :  { %93 = vadd.xlane.f32.xlu0 %v92_v8  ;;  %472 = vmatpush3.bf16.msra.mxu1 %v524_v13  ;;  %v537_v40 = vld [vmem:[#allocation8 + $0x10] sm:$0xff]   ;;  %v425_v41 = vld [vmem:[%s752_s2] ss:$0 sm:$0xff]  ;;  %v539_v49 = vld [vmem:[#allocation8] sm:$0xff]  }
  0x3b   :  { %473 = vmatprep.subr.bf16.mxu1 %v658_v11  ;;  %v538_v48 = vld [vmem:[#allocation8 + $0x8] sm:$0xff]  }
  0x3c   :  { %v427_v50 = vld [vmem:[%s754_s4] ss:$0 sm:$0xff]  ;;  %s660_s4 = smov [#allocation10]  }
  0x3d   :  { %v436_v58 = vld [vmem:[%s756_s6] ss:$0 sm:$0xff]  ;;  %s414_s26 = sshll.u32 %s660_s4, 4  ;;  %s415_s26 = int_to_ptr.vmem [resolvable:$true] %s414_s26 }
  0x3e   :  { %98 = vadd.xlane.f32.xlu0 %v97_v9  ;;  %474 = vmatpush3.bf16.msra.mxu1 %v525_v14  ;;  %s622_s27 = scalar_lea.vmem %s415_s26, 32  ;;  %p627_p7 = scmp.lt.s32.totalorder %s415_s26, %s415_s26 }
  0x3f   :  { %475 = vmatprep.subr.bf16.mxu1 %v658_v11  ;;  %p623_p6 = scmp.ne.s32.totalorder %s415_s26, %s622_s27  ;;  %p628_p8 = scmp.lt.s32.totalorder %s622_s27, %s622_s27 }
  0x41   :  { %p629_p9 = por %p628_p8, %p627_p7 }
  0x42   :  { %476 = vmatpush3.bf16.msra.mxu1 %v526_v15 }
  0x43   :  { %477 = vmatprep.subr.bf16.mxu1 %v658_v11  ;;  %p630_p10 = pnand %p629_p9, %p623_p6 }
  0x46   :  { %478 = vmatpush3.bf16.msra.mxu1 %v527_v16 }
  0x47   :  { %479 = vmatprep.subr.bf16.mxu1 %v658_v11 }
  0x4a   :  { %480 = vmatpush3.bf16.msra.mxu1 %v528_v17 }
  0x4b   :  { %481 = vmatprep.subr.bf16.mxu1 %v658_v11 }
  0x4e   :  { %482 = vmatpush3.bf16.msra.mxu1 %v529_v18 }
  0x4f   :  { %483 = vmatprep.subr.bf16.mxu1 %v658_v11 }
  0x52   :  { %484 = vmatpush3.bf16.msra.mxu1 %v530_v19 }
  0x53   :  { %485 = vmatprep.subr.bf16.mxu1 %v658_v11 }
  0x56   :  { %486 = vmatpush3.bf16.msra.mxu1 %v531_v34 }
  0xc3   :  { %v94_v21 = vpop.xlane.xlu0 %93 }
  0xc4   :  { %v100_v24 = vpack.c.bf16 %v94_v21, %v94_v21 }
  0xc6   :  { %v112_v27 = vunpack.c.l.b16 %v100_v24 }
  0xc7   :  { %v99_v25 = vpop.xlane.xlu0 %98 }
  0xc8   :  { %v101_v28 = vpack.c.bf16 %v99_v25, %v99_v25  ;;  %v119_v30 = vrot.slane %v112_v27, %v118_v26 }
  0xca   :  { %v113_v29 = vunpack.c.l.b16 %v101_v28 }
  0xcc   :  { %v123_v31 = vrot.slane %v113_v29, %v118_v26 }
  0xce   :  { %v125_v32 = vsel %vm124_vm3, %v123_v31, %v119_v30 }
  0xcf   :  { %v126_v33 = vpack.c.b16 %v125_v32, %v125_v32 }
  0xd1   :  { %468 = vmatmul.mubr.msk.bf16.vlgmr.msra.gmra.mxu0 %vm127_vm4, %v126_v33 }
  0xd2   :  { %507 = vmatprep.mubr.msk.bf16.mxu0 %vm659_vm2, %v658_v11  ;;  %492 = vmatpush3.bf16.msra.mxu0 %v532_v35 }
  0xd3   :  { %493 = vmatprep.subr.bf16.mxu0 %v658_v11 }
  0xd6   :  { %494 = vmatpush3.bf16.msra.mxu0 %v533_v36 }
  0xd7   :  { %495 = vmatprep.subr.bf16.mxu0 %v658_v11 }
  0xda   :  { %496 = vmatpush3.bf16.msra.mxu0 %v534_v37 }
  0xdb   :  { %497 = vmatprep.subr.bf16.mxu0 %v658_v11 }
  0xde   :  { %498 = vmatpush3.bf16.msra.mxu0 %v535_v38 }
  0xdf   :  { %499 = vmatprep.subr.bf16.mxu0 %v658_v11 }
  0xe2   :  { %500 = vmatpush3.bf16.msra.mxu0 %v536_v39 }
  0xe3   :  { %501 = vmatprep.subr.bf16.mxu0 %v658_v11 }
  0xe6   :  { %502 = vmatpush3.bf16.msra.mxu0 %v537_v40 }
  0xe7   :  { %503 = vmatprep.subr.bf16.mxu0 %v658_v11 }
  0xea   :  { %504 = vmatpush3.bf16.msra.mxu0 %v538_v48 }
  0xeb   :  { %505 = vmatprep.subr.bf16.mxu0 %v658_v11 }
  0xee   :  { %506 = vmatpush3.bf16.msra.mxu0 %v539_v49 }
 0x191   :  { %v169_v42 = vpop.f32.mrf.mxu0 }
 0x192   :  { %v170_v43 = vadd.f32 %v425_v41, %v169_v42 }
 0x193   :  { %v469_v44 = vpop.f32.mrf.mxu0 }
 0x194   :  { %v175_v45 = vpack.c.bf16 %v170_v43, %v170_v43 }
 0x195   :  { %v172_v46 = vpop.f32.mrf.mxu0 }
 0x196   :  { %488 = vmatmul.mubr.bf16.vlgmr.msra.gmra.mxu1 %v175_v45 }
 0x197   :  { %v470_v47 = vpop.f32.mrf.mxu0 }
 0x256   :  { %v281_v51 = vpop.f32.mrf.mxu1 }
 0x257   :  { %v282_v52 = vadd.f32 %v427_v50, %v281_v51 }
 0x258   :  { %v489_v53 = vpop.f32.mrf.mxu1 }
 0x259   :  { %v287_v54 = vmax.f32 %v282_v52, 0.0 }
 0x25a   :  { %v284_v55 = vpop.f32.mrf.mxu1 }
 0x25b   :  { %v288_v56 = vpack.c.bf16 %v287_v54, %v287_v54 }
 0x25c   :  { %v490_v57 = vpop.f32.mrf.mxu1 }
 0x25d   :  { %508 = vmatmul.mubr.bf16.vlgmr.msra.gmra.mxu0 %v288_v56 }
 0x31d   :  { %v394_v59 = vpop.f32.mrf.mxu0 }
 0x31e   :  { %v395_v60 = vadd.f32 %v436_v58, %v394_v59 }
 0x31f   :  { %v509_v61 = vpop.f32.mrf.mxu0 }
 0x320   :  { %v400_v62 = vmul.f32 %v395_v60, %v395_v60 }
 0x321   :  { %v397_v63 = vpop.f32.mrf.mxu0 }
 0x322   :  { %v401_v0 = vsel %vm131_vm1, %v400_v62, 0.0 }
 0x323   :  { %402 = vadd.xlane.f32.xlu1 %v401_v0  ;;  %v510_v1 = vpop.f32.mrf.mxu0 }
 0x3ac   :  { %v403_v2 = vpop.xlane.xlu1 %402 }
 0x3ad   :  { %v404_v3 = vmax.f32 %v403_v2, 1e-24 }
 0x3af   :  { %540 = vrsqrt.f32 %v404_v3 }
 0x3bc   :  { %v541_v4 = vpop.eup %540 }
 0x3bd   :  { %v406_v5 = vmul.f32 %v541_v4, %v395_v60 }
 0x3bf   :  { %407 = vst [vmem:[#allocation10] sm:$0x3] %v406_v5 }
 0x3c0   :  { %633 = shalt.err (!%p630_p10)
}
 0x3c1   :  { %417 = dma.vmem_to_hbm [thread:$0]  %s415_s26, 32, %s757_s7, [#allocation4]  }
 0x3c2   :  { %648 = dma.done.wait [#allocation4], 32  }
 0x3c3   :  { %649 = vsyncadd [#allocation4], 4294967264 }
 0x3c4   :  { %421 = vsyncpa [#allocation3], 1 }
 0x3c5   :  { %422 = vsyncpa [#allocation6], 1 }
 0x3c6   :  { %423 = vsyncpa [#allocation9], 1 }
 0x3c7   :  { %424 = vsyncpa [#allocation4], 1 }

// kernel: tpu_custom_call.1
= control target key start
LH: loop header
LB: loop body
LE: loop exit
PB: predicated region body
PF: predicated region fallthrough
CT: control target
= control target key end

     0   :  { %12 = vsyncpa [#allocation3], 0  ;;  %s750_s0 = inlined_call_operand.hbm [shape: f32[2,4,256], index: 0, kind: input, shape index: {}]   ;;  %s751_s1 = inlined_call_operand.hbm [shape: bf16[4,128], index: 1, kind: input, shape index: {}]   ;;  %s752_s2 = inlined_call_operand.vmem [shape: f32[1,128], index: 2, kind: input, shape index: {}]   ;;  %s753_s3 = inlined_call_operand.hbm [shape: bf16[128,128], index: 3, kind: input, shape index: {}]   ;;  %s754_s4 = inlined_call_operand.vmem [shape: f32[1,128], index: 4, kind: input, shape index: {}]   ;;  %s755_s5 = inlined_call_operand.hbm [shape: bf16[128,128], index: 5, kind: input, shape index: {}]   ;;  %s756_s6 = inlined_call_operand.vmem [shape: f32[1,128], index: 6, kind: input, shape index: {}]   ;;  %s757_s7 = inlined_call_operand.hbm [shape: f32[2,128], index: 7, kind: output, shape index: {}]  }
   0x1   :  { %13 = vsyncpa [#allocation6], 0 }
   0x2   :  { %14 = vsyncpa [#allocation9], 0 }
   0x3   :  { %15 = vsyncpa [#allocation4], 0  ;;  %s650_s24 = smov [#allocation5]   ;;  %s651_s26 = smov [#allocation2]  }
   0x4   :  { %s34_s25 = sshll.u32 %s650_s24, 4  ;;  %s21_s27 = sshll.u32 %s651_s26, 4  ;;  %s35_s25 = int_to_ptr.vmem [resolvable:$true] %s34_s25  ;;  %s22_s27 = int_to_ptr.vmem [resolvable:$true] %s21_s27 }
   0x5   :  { %s550_s28 = scalar_lea.vmem %s35_s25, 32  ;;  %p555_p1 = scmp.lt.s32.totalorder %s35_s25, %s35_s25 }
   0x6   :  { %p551_p0 = scmp.ne.s32.totalorder %s35_s25, %s550_s28  ;;  %p556_p2 = scmp.lt.s32.totalorder %s550_s28, %s550_s28 }
   0x8   :  { %p557_p3 = por %p556_p2, %p555_p1 }
   0xa   :  { %p558_p4 = pnand %p557_p3, %p551_p0 }
   0xc   :  { %561 = shalt.err (!%p558_p4)
}
   0xd   :  { %37 = dma.hbm_to_vmem [thread:$0]  %s751_s1, 32, %s35_s25, [#allocation6]  }
   0xe   :  { %s570_s8 = scalar_lea.vmem %s22_s27, 256  ;;  %p575_p6 = scmp.lt.s32.totalorder %s22_s27, %s22_s27 }
   0xf   :  { %p571_p5 = scmp.ne.s32.totalorder %s22_s27, %s570_s8  ;;  %p576_p7 = scmp.lt.s32.totalorder %s570_s8, %s570_s8 }
  0x11   :  { %p577_p8 = por %p576_p7, %p575_p6 }
  0x13   :  { %p578_p9 = pnand %p577_p8, %p571_p5 }
  0x15   :  { %581 = shalt.err (!%p578_p9)
}
  0x16   :  { %s652_s9 = smov 128   ;;  %s653_s10 = smov 8  }
  0x17   :  { %27 = dma.hbm_to_vmem [thread:$0]  %s750_s0, 256, %s22_s27, [#allocation3], %s652_s9, %s652_s9, %s653_s10  }
  0x18   :  { %s654_s13 = smov [#allocation7]  }
  0x19   :  { %s45_s14 = sshll.u32 %s654_s13, 4  ;;  %s46_s14 = int_to_ptr.vmem [resolvable:$true] %s45_s14 }
  0x1a   :  { %s590_s15 = scalar_lea.vmem %s46_s14, 1024  ;;  %p595_p11 = scmp.lt.s32.totalorder %s46_s14, %s46_s14 }
  0x1b   :  { %p591_p10 = scmp.ne.s32.totalorder %s46_s14, %s590_s15  ;;  %p596_p12 = scmp.lt.s32.totalorder %s590_s15, %s590_s15 }
  0x1d   :  { %p597_p13 = por %p596_p12, %p595_p11 }
  0x1f   :  { %p598_p0 = pnand %p597_p13, %p591_p10 }
  0x21   :  { %601 = shalt.err (!%p598_p0)
}
  0x22   :  { %s655_s1 = smov 64   ;;  %s656_s16 = smov 4  }
  0x23   :  { %51 = dma.hbm_to_vmem [thread:$0]  %s753_s3, 1024, %s46_s14, [#allocation6], %s655_s1, %s655_s1, %s656_s16  }
  0x24   :  { %s657_s19 = smov [#allocation8]  }
  0x25   :  { %s59_s20 = sshll.u32 %s657_s19, 4  ;;  %s60_s20 = int_to_ptr.vmem [resolvable:$true] %s59_s20 }
  0x26   :  { %s610_s0 = scalar_lea.vmem %s60_s20, 1024  ;;  %p615_p2 = scmp.lt.s32.totalorder %s60_s20, %s60_s20 }
  0x27   :  { %p611_p1 = scmp.ne.s32.totalorder %s60_s20, %s610_s0  ;;  %p616_p3 = scmp.lt.s32.totalorder %s610_s0, %s610_s0 }
  0x29   :  { %p617_p4 = por %p616_p3, %p615_p2 }
  0x2b   :  { %p618_p5 = pnand %p617_p4, %p611_p1 }
  0x2d   :  { %621 = shalt.err (!%p618_p5)
}
  0x2e   :  { %65 = dma.hbm_to_vmem [thread:$0]  %s755_s5, 1024, %s60_s20, [#allocation9], %s655_s1, %s655_s1, %s656_s16  }
  0x2f   :  { %642 = dma.done.wait [#allocation3], 256  }
  0x30   :  { %643 = vsyncadd [#allocation3], 4294967040 }
  0x31   :  { %644 = dma.done.wait [#allocation6], 1056  }
  0x32   :  { %645 = vsyncadd [#allocation6], 4294966240 }
  0x33   :  { %646 = dma.done.wait [#allocation9], 1024  }
  0x34   :  { %647 = vsyncadd [#allocation9], 4294966272  ;;  %vm89_vm0 = vcmask 1043456   ;;  %v81_v0 = vld [vmem:[#allocation2] sm:$0xff]  ;;  %v82_v1 = vld [vmem:[#allocation2 + $0x8] sm:$0xff]  ;;  %vm131_vm1 = vcmask 1041408   ;;  %v114_v20 = vlaneseq }
  0x35   :  { %v85_v2 = vcombine.high %v81_v0, %v81_v0  ;;  %v90_v3 = vsel %vm89_vm0, %v81_v0, 0.0  ;;  %v86_v4 = vcombine.high %v82_v1, %v82_v1  ;;  %v95_v5 = vsel %vm89_vm0, %v82_v1, 0.0  ;;  %v102_v10 = vld [vmem:[#allocation5] sm:$0x3]  ;;  %v525_v14 = vld [vmem:[#allocation7 + $0x30] sm:$0xff]   ;;  %v526_v15 = vld [vmem:[#allocation7 + $0x28] sm:$0xff]  }
  0x36   :  { %v658_v11 = vmov 0.0   ;;  %v133_v12 = vsel %vm131_vm1, %v102_v10, 0  ;;  %vm659_vm2 = vmmov 0   ;;  %v524_v13 = vld [vmem:[#allocation7 + $0x38] sm:$0xff]   ;;  %v527_v16 = vld [vmem:[#allocation7 + $0x20] sm:$0xff]   ;;  %v529_v18 = vld [vmem:[#allocation7 + $0x10] sm:$0xff]  }
  0x37   :  { %v91_v6 = vsel %vm89_vm0, %v85_v2, 0.0  ;;  %v96_v7 = vsel %vm89_vm0, %v86_v4, 0.0  ;;  %465 = vmatprep.subr.bf16.mxu0 %v658_v11  ;;  %471 = vmatprep.subr.bf16.mxu1 %v658_v11  ;;  %v528_v17 = vld [vmem:[#allocation7 + $0x18] sm:$0xff]   ;;  %v530_v19 = vld [vmem:[#allocation7 + $0x8] sm:$0xff]   ;;  %v115_v22 = vand.u32 127, %v114_v20  ;;  %v117_v23 = vshrl.u32 %v114_v20, 7 }
  0x38   :  { %v92_v8 = vadd.f32 %v91_v6, %v90_v3  ;;  %v97_v9 = vadd.f32 %v96_v7, %v95_v5  ;;  %466 = vmatpush3.bf16.msra.mxu0 %v133_v12  ;;  %467 = vmatprep.mubr.msk.bf16.mxu0 %vm659_vm2, %v658_v11  ;;  %vm124_vm3 = vcmask 1041409   ;;  %vm127_vm4 = vcmask 31744   ;;  %v531_v34 = vld [vmem:[#allocation7] sm:$0xff]   ;;  %v532_v35 = vld [vmem:[#allocation8 + $0x38] sm:$0xff]   ;;  %v533_v36 = vld [vmem:[#allocation8 + $0x30] sm:$0xff]  }
  0x39   :  { %491 = vmatprep.subr.bf16.mxu0 %v658_v11  ;;  %487 = vmatprep.mubr.msk.bf16.mxu1 %vm659_vm2, %v658_v11  ;;  %v118_v26 = vsub.s32 %v115_v22, %v117_v23  ;;  %v534_v37 = vld [vmem:[#allocation8 + $0x28] sm:$0xff]   ;;  %v535_v38 = vld [vmem:[#allocation8 + $0x20] sm:$0xff]   ;;  %v536_v39 = vld [vmem:[#allocation8 + $0x18] sm:$0xff]  }
  0x3a   :  { %93 = vadd.xlane.f32.xlu0 %v92_v8  ;;  %472 = vmatpush3.bf16.msra.mxu1 %v524_v13  ;;  %v537_v40 = vld [vmem:[#allocation8 + $0x10] sm:$0xff]   ;;  %v425_v41 = vld [vmem:[%s752_s2] ss:$0 sm:$0xff]  ;;  %v539_v49 = vld [vmem:[#allocation8] sm:$0xff]  }
  0x3b   :  { %473 = vmatprep.subr.bf16.mxu1 %v658_v11  ;;  %v538_v48 = vld [vmem:[#allocation8 + $0x8] sm:$0xff]  }
  0x3c   :  { %v427_v50 = vld [vmem:[%s754_s4] ss:$0 sm:$0xff]  ;;  %s660_s4 = smov [#allocation10]  }
  0x3d   :  { %v436_v58 = vld [vmem:[%s756_s6] ss:$0 sm:$0xff]  ;;  %s414_s26 = sshll.u32 %s660_s4, 4  ;;  %s415_s26 = int_to_ptr.vmem [resolvable:$true] %s414_s26 }
  0x3e   :  { %98 = vadd.xlane.f32.xlu0 %v97_v9  ;;  %474 = vmatpush3.bf16.msra.mxu1 %v525_v14  ;;  %s622_s27 = scalar_lea.vmem %s415_s26, 32  ;;  %p627_p7 = scmp.lt.s32.totalorder %s415_s26, %s415_s26 }
  0x3f   :  { %475 = vmatprep.subr.bf16.mxu1 %v658_v11  ;;  %p623_p6 = scmp.ne.s32.totalorder %s415_s26, %s622_s27  ;;  %p628_p8 = scmp.lt.s32.totalorder %s622_s27, %s622_s27 }
  0x41   :  { %p629_p9 = por %p628_p8, %p627_p7 }
  0x42   :  { %476 = vmatpush3.bf16.msra.mxu1 %v526_v15 }
  0x43   :  { %477 = vmatprep.subr.bf16.mxu1 %v658_v11  ;;  %p630_p10 = pnand %p629_p9, %p623_p6 }
  0x46   :  { %478 = vmatpush3.bf16.msra.mxu1 %v527_v16 }
  0x47   :  { %479 = vmatprep.subr.bf16.mxu1 %v658_v11 }
  0x4a   :  { %480 = vmatpush3.bf16.msra.mxu1 %v528_v17 }
  0x4b   :  { %481 = vmatprep.subr.bf16.mxu1 %v658_v11 }
  0x4e   :  { %482 = vmatpush3.bf16.msra.mxu1 %v529_v18 }
  0x4f   :  { %483 = vmatprep.subr.bf16.mxu1 %v658_v11 }
  0x52   :  { %484 = vmatpush3.bf16.msra.mxu1 %v530_v19 }
  0x53   :  { %485 = vmatprep.subr.bf16.mxu1 %v658_v11 }
  0x56   :  { %486 = vmatpush3.bf16.msra.mxu1 %v531_v34 }
  0xc3   :  { %v94_v21 = vpop.xlane.xlu0 %93 }
  0xc4   :  { %v100_v24 = vpack.c.bf16 %v94_v21, %v94_v21 }
  0xc6   :  { %v112_v27 = vunpack.c.l.b16 %v100_v24 }
  0xc7   :  { %v99_v25 = vpop.xlane.xlu0 %98 }
  0xc8   :  { %v101_v28 = vpack.c.bf16 %v99_v25, %v99_v25  ;;  %v119_v30 = vrot.slane %v112_v27, %v118_v26 }
  0xca   :  { %v113_v29 = vunpack.c.l.b16 %v101_v28 }
  0xcc   :  { %v123_v31 = vrot.slane %v113_v29, %v118_v26 }
  0xce   :  { %v125_v32 = vsel %vm124_vm3, %v123_v31, %v119_v30 }
  0xcf   :  { %v126_v33 = vpack.c.b16 %v125_v32, %v125_v32 }
  0xd1   :  { %468 = vmatmul.mubr.msk.bf16.vlgmr.msra.gmra.mxu0 %vm127_vm4, %v126_v33 }
  0xd2   :  { %507 = vmatprep.mubr.msk.bf16.mxu0 %vm659_vm2, %v658_v11  ;;  %492 = vmatpush3.bf16.msra.mxu0 %v532_v35 }
  0xd3   :  { %493 = vmatprep.subr.bf16.mxu0 %v658_v11 }
  0xd6   :  { %494 = vmatpush3.bf16.msra.mxu0 %v533_v36 }
  0xd7   :  { %495 = vmatprep.subr.bf16.mxu0 %v658_v11 }
  0xda   :  { %496 = vmatpush3.bf16.msra.mxu0 %v534_v37 }
  0xdb   :  { %497 = vmatprep.subr.bf16.mxu0 %v658_v11 }
  0xde   :  { %498 = vmatpush3.bf16.msra.mxu0 %v535_v38 }
  0xdf   :  { %499 = vmatprep.subr.bf16.mxu0 %v658_v11 }
  0xe2   :  { %500 = vmatpush3.bf16.msra.mxu0 %v536_v39 }
  0xe3   :  { %501 = vmatprep.subr.bf16.mxu0 %v658_v11 }
  0xe6   :  { %502 = vmatpush3.bf16.msra.mxu0 %v537_v40 }
  0xe7   :  { %503 = vmatprep.subr.bf16.mxu0 %v658_v11 }
  0xea   :  { %504 = vmatpush3.bf16.msra.mxu0 %v538_v48 }
  0xeb   :  { %505 = vmatprep.subr.bf16.mxu0 %v658_v11 }
  0xee   :  { %506 = vmatpush3.bf16.msra.mxu0 %v539_v49 }
 0x191   :  { %v169_v42 = vpop.f32.mrf.mxu0 }
 0x192   :  { %v170_v43 = vadd.f32 %v425_v41, %v169_v42 }
 0x193   :  { %v469_v44 = vpop.f32.mrf.mxu0 }
 0x194   :  { %v175_v45 = vpack.c.bf16 %v170_v43, %v170_v43 }
 0x195   :  { %v172_v46 = vpop.f32.mrf.mxu0 }
 0x196   :  { %488 = vmatmul.mubr.bf16.vlgmr.msra.gmra.mxu1 %v175_v45 }
 0x197   :  { %v470_v47 = vpop.f32.mrf.mxu0 }
 0x256   :  { %v281_v51 = vpop.f32.mrf.mxu1 }
 0x257   :  { %v282_v52 = vadd.f32 %v427_v50, %v281_v51 }
 0x258   :  { %v489_v53 = vpop.f32.mrf.mxu1 }
 0x259   :  { %v287_v54 = vmax.f32 %v282_v52, 0.0 }
 0x25a   :  { %v284_v55 = vpop.f32.mrf.mxu1 }
 0x25b   :  { %v288_v56 = vpack.c.bf16 %v287_v54, %v287_v54 }
 0x25c   :  { %v490_v57 = vpop.f32.mrf.mxu1 }
 0x25d   :  { %508 = vmatmul.mubr.bf16.vlgmr.msra.gmra.mxu0 %v288_v56 }
 0x31d   :  { %v394_v59 = vpop.f32.mrf.mxu0 }
 0x31e   :  { %v395_v60 = vadd.f32 %v436_v58, %v394_v59 }
 0x31f   :  { %v509_v61 = vpop.f32.mrf.mxu0 }
 0x320   :  { %v400_v62 = vmul.f32 %v395_v60, %v395_v60 }
 0x321   :  { %v397_v63 = vpop.f32.mrf.mxu0 }
 0x322   :  { %v401_v0 = vsel %vm131_vm1, %v400_v62, 0.0 }
 0x323   :  { %402 = vadd.xlane.f32.xlu1 %v401_v0  ;;  %v510_v1 = vpop.f32.mrf.mxu0 }
 0x3ac   :  { %v403_v2 = vpop.xlane.xlu1 %402 }
 0x3ad   :  { %v404_v3 = vmax.f32 %v403_v2, 1e-24 }
 0x3af   :  { %540 = vrsqrt.f32 %v404_v3 }
 0x3bc   :  { %v541_v4 = vpop.eup %540 }
 0x3bd   :  { %v406_v5 = vmul.f32 %v541_v4, %v395_v60 }
 0x3bf   :  { %407 = vst [vmem:[#allocation10] sm:$0x3] %v406_v5 }
 0x3c0   :  { %633 = shalt.err (!%p630_p10)
}
 0x3c1   :  { %417 = dma.vmem_to_hbm [thread:$0]  %s415_s26, 32, %s757_s7, [#allocation4]  }
 0x3c2   :  { %648 = dma.done.wait [#allocation4], 32  }
 0x3c3   :  { %649 = vsyncadd [#allocation4], 4294967264 }
 0x3c4   :  { %421 = vsyncpa [#allocation3], 1 }
 0x3c5   :  { %422 = vsyncpa [#allocation6], 1 }
 0x3c6   :  { %423 = vsyncpa [#allocation9], 1 }
 0x3c7   :  { %424 = vsyncpa [#allocation4], 1 }

</bundles_post_ra>
